<compile_context>
chip_gen: v7x
topology: tpu7x:2x2x1
jax: 0.10.0
libtpu: 0.0.40
codegen_flags: <defaults>
</compile_context>

<pallas_src>
import functools

import jax
import jax.numpy as jnp
from jax import lax
from jax.experimental import pallas as pl
from jax.experimental.pallas import tpu as pltpu


def _round_up(x, m):
    return ((x + m - 1) // m) * m


def _vmem_capacity_bytes():
    """Physical VMEM per TensorCore, with a conservative (v7x) fallback."""
    try:
        info = pltpu.get_tpu_info()
        cap = getattr(info, "vmem_capacity_bytes", None)
        if cap:
            return int(cap)
    except Exception:
        pass
    return 64 * 1024 * 1024


def _head_kernel(h_ref, w1_ref, b1_ref, w2_ref, b2_ref, out_ref, acc_ref, *,
                 true_seq_len, inv_seq_len, needs_seq_mask):
    # h_ref: (TB, TS, H) bf16/f32   w1: (H, F1)  b1: (1, F1)
    # w2: (F1, C_pad)  b2: (1, C_pad)   out_ref: (TB, C_pad)
    # acc_ref: (TB, H) f32 scratch, resident across the S (arbitrary) grid axis.
    s = pl.program_id(1)

    @pl.when(s == 0)
    def _():
        acc_ref[...] = jnp.zeros_like(acc_ref)

    # Stream this S tile, cast to f32 (v5e has no bf16 VALU), partial-sum into acc.
    h = h_ref[...].astype(jnp.float32)
    if needs_seq_mask:
        # Partial final tile: zero OOB sequence rows with a select (not a multiply)
        # so garbage/NaN past the true extent can't poison the accumulator.
        ts = h_ref.shape[1]
        pos = s * ts + lax.broadcasted_iota(jnp.int32, h.shape, 1)
        h = jnp.where(pos < true_seq_len, h, 0.0)
    acc_ref[...] += jnp.sum(h, axis=1)                      # (TB, H), f32

    @pl.when(s == pl.num_programs(1) - 1)
    def _():
        # torch.mean(dim=1): single 1/S scale on (TB, H), once per batch tile.
        pooled = acc_ref[...] * inv_seq_len

        # fc1 + ReLU (lane-dense F1=128; tiny matmul, never the bottleneck)
        x = jnp.dot(pooled, w1_ref[...],
                    preferred_element_type=jnp.float32) + b1_ref[...]
        x = jnp.maximum(x, 0.0)

        # fc2 (+ -1e30 bias on padded classes) + softmax over lanes (exact divide)
        logits = jnp.dot(x, w2_ref[...],
                         preferred_element_type=jnp.float32) + b2_ref[...]
        m = jnp.max(logits, axis=1, keepdims=True)
        e = jnp.exp(logits - m)
        out_ref[...] = e / jnp.sum(e, axis=1, keepdims=True)


def peft_classification_head(last_hidden_state, w1, b1, w2, b2, *, batch_tile=8):
    """mean-pool(hidden, dim=1) -> fc1 -> ReLU -> fc2 -> softmax, one pallas_call."""
    B, S, H = last_hidden_state.shape
    C = w2.shape[1]
    itemsize = jnp.dtype(last_hidden_state.dtype).itemsize

    # ---- tiling: TS derived from H/dtype and device VMEM (double-buffered) ----
    TB = batch_tile
    vmem_cap = _vmem_capacity_bytes()
    stream_budget = (vmem_cap * 5) // 8                 # budget for 2x hidden buffers
    per_row_bytes = 2 * TB * H * itemsize               # 2 = double-buffering
    ts_cap = max(8, (stream_budget // per_row_bytes) // 8 * 8)
    TS = min(_round_up(S, 8), ts_cap)
    vmem_limit = (vmem_cap * 3) // 4                    # headroom for compiler scratch

    grid_b = pl.cdiv(B, TB)
    grid_s = pl.cdiv(S, TS)
    B_out = grid_b * TB                                 # tiny padded output slab only

    # ---- lane-dense weight padding (tiny arrays; the big tensor is untouched) ----
    F1 = _round_up(max(w1.shape[1], 128), 128)          # fc1 width -> full lanes
    C_pad = _round_up(max(C, 128), 128)                 # classes -> full lanes
    b1 = b1.reshape(1, -1).astype(jnp.float32)
    b2 = b2.reshape(1, -1).astype(jnp.float32)
    w1_p = jnp.zeros((H, F1), jnp.float32).at[:, :w1.shape[1]].set(w1.astype(jnp.float32))
    b1_p = jnp.zeros((1, F1), jnp.float32).at[:, :b1.shape[1]].set(b1)
    # Padded classes get logit -1e30 -> exactly 0 softmax weight.
    w2_p = jnp.zeros((F1, C_pad), jnp.float32).at[:w2.shape[0], :C].set(w2.astype(jnp.float32))
    b2_p = jnp.full((1, C_pad), -1e30, jnp.float32).at[:, :C].set(b2)

    kernel = functools.partial(
        _head_kernel,
        true_seq_len=S,
        inv_seq_len=1.0 / S,
        needs_seq_mask=(S % TS != 0),
    )

    cost = pl.CostEstimate(
        flops=int(2 * B * S * H + 2 * B_out * (H * F1 + F1 * C_pad)),
        transcendentals=int(B_out * C_pad),
        bytes_accessed=int(B * S * H * itemsize
                           + (H * F1 + F1 + F1 * C_pad + C_pad) * 4
                           + B_out * C_pad * 4),
    )

    out = pl.pallas_call(
        kernel,
        out_shape=jax.ShapeDtypeStruct((B_out, C_pad), jnp.float32),
        grid_spec=pltpu.PrefetchScalarGridSpec(
            num_scalar_prefetch=0,
            grid=(grid_b, grid_s),
            in_specs=[
                pl.BlockSpec((TB, TS, H), lambda b, s: (b, s, 0)),   # hidden (streamed)
                pl.BlockSpec((H, F1), lambda b, s: (0, 0)),          # w1 (resident)
                pl.BlockSpec((1, F1), lambda b, s: (0, 0)),          # b1
                pl.BlockSpec((F1, C_pad), lambda b, s: (0, 0)),      # w2 (padded)
                pl.BlockSpec((1, C_pad), lambda b, s: (0, 0)),       # b2 (padded)
            ],
            out_specs=pl.BlockSpec((TB, C_pad), lambda b, s: (b, 0)),
            scratch_shapes=[pltpu.VMEM((TB, H), jnp.float32)],       # pooled-sum acc
        ),
        compiler_params=pltpu.CompilerParams(
            dimension_semantics=("parallel", "arbitrary"),  # B across TCs, S = reduction
            vmem_limit_bytes=int(vmem_limit),
        ),
        cost_estimate=cost,
    )(last_hidden_state, w1_p, b1_p, w2_p, b2_p)

    return out[:B, :C]


def synthetic_backbone(input_ids, attention_mask, emb_table):
    """Deterministic stand-in for the quantized transformer backbone.

    Produces last_hidden_state (B, S, H) in bf16 so the dominant HBM stream into
    the head kernel is half-width.  The attention_mask is accepted (as in the
    PyTorch forward) but the stand-in lookup does not use it.
    """
    del attention_mask
    return emb_table[input_ids].astype(jnp.bfloat16)     # (B, S, H)


if __name__ == "__main__":
    key = jax.random.PRNGKey(0)
    k_emb, k_ids, k_w1, k_b1, k_w2, k_b2 = jax.random.split(key, 6)

    # Small, forward-consistent shapes.
    B, S, H = 2, 8, 32        # batch, seq, hidden_size
    NUM_CLASS = 4
    VOCAB = 50

    # Synthetic backbone parameters + inputs.
    emb_table = jax.random.normal(k_emb, (VOCAB, H), dtype=jnp.float32)
    input_ids = jax.random.randint(k_ids, (B, S), 0, VOCAB, dtype=jnp.int32)
    mask = jnp.ones((B, S), dtype=jnp.int32)

    # Head parameters, PyTorch-Linear-style uniform init (deterministic).
    lim1 = 1.0 / jnp.sqrt(H)
    w1 = jax.random.uniform(k_w1, (H, 16), jnp.float32, -lim1, lim1)
    b1 = jax.random.uniform(k_b1, (1, 16), jnp.float32, -lim1, lim1)
    lim2 = 1.0 / jnp.sqrt(16.0)
    w2 = jax.random.uniform(k_w2, (16, NUM_CLASS), jnp.float32, -lim2, lim2)
    b2 = jax.random.uniform(k_b2, (1, NUM_CLASS), jnp.float32, -lim2, lim2)

    # Forward: backbone (glue JAX) -> fused Pallas head kernel (pool + MLP + softmax).
    last_hidden_state = synthetic_backbone(input_ids, mask, emb_table)
    output = peft_classification_head(last_hidden_state, w1, b1, w2, b2)
    output = jax.block_until_ready(output)

    # Pure-JAX reference (mirrors the PyTorch forward semantics: plain mean over dim=1).
    pooled = jnp.mean(last_hidden_state.astype(jnp.float32), axis=1)
    x_ref = jnp.maximum(pooled @ w1 + b1, 0.0)
    ref = jax.nn.softmax(x_ref @ w2 + b2, axis=1)

    assert output.shape == (B, NUM_CLASS)
    assert jnp.allclose(output, ref, atol=1e-4, rtol=1e-4)
    assert jnp.allclose(jnp.sum(output, axis=1), 1.0, atol=1e-5)

    print("KERNEL_OK")
</pallas_src>

<mosaic_0001>
module attributes {stable_mosaic.version = 11 : i64} {
  func.func @_head_kernel(%arg0: i32, %arg1: i32, %arg2: memref<8x8x32xbf16, #tpu.memory_space<vmem>>, %arg3: memref<32x128xf32, #tpu.memory_space<vmem>>, %arg4: memref<1x128xf32, #tpu.memory_space<vmem>>, %arg5: memref<128x128xf32, #tpu.memory_space<vmem>>, %arg6: memref<1x128xf32, #tpu.memory_space<vmem>>, %arg7: memref<8x128xf32, #tpu.memory_space<vmem>>, %arg8: memref<8x32xf32, #tpu.memory_space<vmem>>) attributes {dimension_semantics = [#tpu.dimension_semantics<parallel>, #tpu.dimension_semantics<arbitrary>], iteration_bounds = array<i64: 1, 1>, scalar_prefetch = 0 : i64, scratch_operands = 1 : i64, tpu.core_type = #tpu.core_type<tc>, window_params = [{transform_indices = @transform_0, window_bounds = array<i64: 8, 8, 32>}, {pipeline_mode = #tpu.pipeline_mode<synchronous>, transform_indices = @transform_1, window_bounds = array<i64: 32, 128>}, {pipeline_mode = #tpu.pipeline_mode<synchronous>, transform_indices = @transform_2, window_bounds = array<i64: 1, 128>}, {pipeline_mode = #tpu.pipeline_mode<synchronous>, transform_indices = @transform_3, window_bounds = array<i64: 128, 128>}, {pipeline_mode = #tpu.pipeline_mode<synchronous>, transform_indices = @transform_4, window_bounds = array<i64: 1, 128>}, {transform_indices = @transform_5, window_bounds = array<i64: 8, 128>}]} {
    %c0_i32 = arith.constant 0 : i32
    %0 = arith.cmpi eq, %arg1, %c0_i32 : i32
    %1 = arith.extui %0 : i1 to i32
    %c0_i32_0 = arith.constant 0 : i32
    %2 = arith.cmpi ne, %1, %c0_i32_0 : i32
    scf.if %2 {
      %cst_9 = arith.constant 0.000000e+00 : f32
      %12 = vector.broadcast %cst_9 : f32 to vector<8x32xf32>
      %c0_10 = arith.constant 0 : index
      %c0_11 = arith.constant 0 : index
      %13 = vector.load %arg8[%c0_10, %c0_11] : memref<8x32xf32, #tpu.memory_space<vmem>>, vector<8x32xf32>
      tpu.vector_store %arg8[%c0_10, %c0_11], %12 {strides = array<i32>} : memref<8x32xf32, #tpu.memory_space<vmem>>, vector<8x32xf32>,
    } else {
    }
    %c0 = arith.constant 0 : index
    %c0_1 = arith.constant 0 : index
    %c0_2 = arith.constant 0 : index
    %3 = vector.load %arg2[%c0, %c0_1, %c0_2] : memref<8x8x32xbf16, #tpu.memory_space<vmem>>, vector<8x8x32xbf16>
    %4 = arith.extf %3 : vector<8x8x32xbf16> to vector<8x8x32xf32>
    %c0_3 = arith.constant 0 : index
    %c0_4 = arith.constant 0 : index
    %5 = vector.load %arg8[%c0_3, %c0_4] : memref<8x32xf32, #tpu.memory_space<vmem>>, vector<8x32xf32>
    %cst = arith.constant dense<0.000000e+00> : vector<8x32xf32>
    %6 = vector.multi_reduction <add>, %4, %cst [1] : vector<8x8x32xf32> to vector<8x32xf32>
    %7 = arith.addf %5, %6 : vector<8x32xf32>
    %c0_5 = arith.constant 0 : index
    %c0_6 = arith.constant 0 : index
    %8 = vector.load %arg8[%c0_5, %c0_6] : memref<8x32xf32, #tpu.memory_space<vmem>>, vector<8x32xf32>
    tpu.vector_store %arg8[%c0_5, %c0_6], %7 {strides = array<i32>} : memref<8x32xf32, #tpu.memory_space<vmem>>, vector<8x32xf32>,
    %c0_i32_7 = arith.constant 0 : i32
    %9 = arith.cmpi eq, %arg1, %c0_i32_7 : i32
    %10 = arith.extui %9 : i1 to i32
    %c0_i32_8 = arith.constant 0 : i32
    %11 = arith.cmpi ne, %10, %c0_i32_8 : i32
    scf.if %11 {
      %c0_9 = arith.constant 0 : index
      %c0_10 = arith.constant 0 : index
      %12 = vector.load %arg8[%c0_9, %c0_10] : memref<8x32xf32, #tpu.memory_space<vmem>>, vector<8x32xf32>
      %cst_11 = arith.constant 1.250000e-01 : f32
      %13 = vector.broadcast %cst_11 : f32 to vector<8x32xf32>
      %14 = arith.mulf %12, %13 : vector<8x32xf32>
      %c0_12 = arith.constant 0 : index
      %c0_13 = arith.constant 0 : index
      %15 = vector.load %arg3[%c0_12, %c0_13] : memref<32x128xf32, #tpu.memory_space<vmem>>, vector<32x128xf32>
      %cst_14 = arith.constant dense<0.000000e+00> : vector<8x128xf32>
      %16 = tpu.matmul %14, %15, %cst_14 {dimension_numbers = #tpu.dot_dimension_numbers<[1], [0], [0], [1], [0, 0, 1, 1], [], []>} : vector<8x32xf32>, vector<32x128xf32>, vector<8x128xf32> -> vector<8x128xf32>
      %c0_15 = arith.constant 0 : index
      %c0_16 = arith.constant 0 : index
      %17 = vector.load %arg4[%c0_15, %c0_16] : memref<1x128xf32, #tpu.memory_space<vmem>>, vector<1x128xf32>
      %18 = vector.broadcast %17 : vector<1x128xf32> to vector<8x128xf32>
      %19 = arith.addf %16, %18 : vector<8x128xf32>
      %cst_17 = arith.constant 0.000000e+00 : f32
      %20 = vector.broadcast %cst_17 : f32 to vector<8x128xf32>
      %21 = arith.maximumf %19, %20 : vector<8x128xf32>
      %c0_18 = arith.constant 0 : index
      %c0_19 = arith.constant 0 : index
      %22 = vector.load %arg5[%c0_18, %c0_19] : memref<128x128xf32, #tpu.memory_space<vmem>>, vector<128x128xf32>
      %cst_20 = arith.constant dense<0.000000e+00> : vector<8x128xf32>
      %23 = tpu.matmul %21, %22, %cst_20 {dimension_numbers = #tpu.dot_dimension_numbers<[1], [0], [0], [1], [0, 0, 1, 1], [], []>} : vector<8x128xf32>, vector<128x128xf32>, vector<8x128xf32> -> vector<8x128xf32>
      %c0_21 = arith.constant 0 : index
      %c0_22 = arith.constant 0 : index
      %24 = vector.load %arg6[%c0_21, %c0_22] : memref<1x128xf32, #tpu.memory_space<vmem>>, vector<1x128xf32>
      %25 = vector.broadcast %24 : vector<1x128xf32> to vector<8x128xf32>
      %26 = arith.addf %23, %25 : vector<8x128xf32>
      %cst_23 = arith.constant dense<0xFF800000> : vector<8xf32>
      %27 = vector.multi_reduction <maximumf>, %26, %cst_23 [1] : vector<8x128xf32> to vector<8xf32>
      %28 = vector.shape_cast %27 : vector<8xf32> to vector<8x1xf32>
      %29 = vector.broadcast %28 : vector<8x1xf32> to vector<8x128xf32>
      %30 = arith.subf %26, %29 : vector<8x128xf32>
      %31 = math.exp %30 : vector<8x128xf32>
      %cst_24 = arith.constant dense<0.000000e+00> : vector<8xf32>
      %32 = vector.multi_reduction <add>, %31, %cst_24 [1] : vector<8x128xf32> to vector<8xf32>
      %33 = vector.shape_cast %32 : vector<8xf32> to vector<8x1xf32>
      %34 = vector.broadcast %33 : vector<8x1xf32> to vector<8x128xf32>
      %35 = arith.divf %31, %34 : vector<8x128xf32>
      %c0_25 = arith.constant 0 : index
      %c0_26 = arith.constant 0 : index
      %36 = vector.load %arg7[%c0_25, %c0_26] : memref<8x128xf32, #tpu.memory_space<vmem>>, vector<8x128xf32>
      tpu.vector_store %arg7[%c0_25, %c0_26], %35 {strides = array<i32>} : memref<8x128xf32, #tpu.memory_space<vmem>>, vector<8x128xf32>,
    } else {
    }
    return
  }
  func.func @transform_0(%arg0: i32, %arg1: i32) -> (i32, i32, i32) {
    %c0_i32 = arith.constant 0 : i32
    %c0_i32_0 = arith.constant 0 : i32
    return %arg0, %arg1, %c0_i32 : i32, i32, i32
  }
  func.func @transform_1(%arg0: i32, %arg1: i32) -> (i32, i32) {
    %c0_i32 = arith.constant 0 : i32
    %c0_i32_0 = arith.constant 0 : i32
    %c0_i32_1 = arith.constant 0 : i32
    return %c0_i32, %c0_i32_0 : i32, i32
  }
  func.func @transform_2(%arg0: i32, %arg1: i32) -> (i32, i32) {
    %c0_i32 = arith.constant 0 : i32
    %c0_i32_0 = arith.constant 0 : i32
    %c0_i32_1 = arith.constant 0 : i32
    return %c0_i32, %c0_i32_0 : i32, i32
  }
  func.func @transform_3(%arg0: i32, %arg1: i32) -> (i32, i32) {
    %c0_i32 = arith.constant 0 : i32
    %c0_i32_0 = arith.constant 0 : i32
    %c0_i32_1 = arith.constant 0 : i32
    return %c0_i32, %c0_i32_0 : i32, i32
  }
  func.func @transform_4(%arg0: i32, %arg1: i32) -> (i32, i32) {
    %c0_i32 = arith.constant 0 : i32
    %c0_i32_0 = arith.constant 0 : i32
    %c0_i32_1 = arith.constant 0 : i32
    return %c0_i32, %c0_i32_0 : i32, i32
  }
  func.func @transform_5(%arg0: i32, %arg1: i32) -> (i32, i32) {
    %c0_i32 = arith.constant 0 : i32
    %c0_i32_0 = arith.constant 0 : i32
    return %arg0, %c0_i32 : i32, i32
  }
}

</mosaic_0001>

<bundles_post_ra>
// kernel: tpu_custom_call.1
= control target key start
LH: loop header
LB: loop body
LE: loop exit
PB: predicated region body
PF: predicated region fallthrough
CT: control target
= control target key end

     0   :  { %10 = vsyncpa [#allocation4], 0  ;;  %s732_s0 = inlined_call_operand.hbm [shape: bf16[2,8,32], index: 0, kind: input, shape index: {}]   ;;  %s733_s1 = inlined_call_operand.hbm [shape: f32[32,128], index: 1, kind: input, shape index: {}]   ;;  %s734_s2 = inlined_call_operand.vmem [shape: f32[1,128], index: 2, kind: input, shape index: {}]   ;;  %s735_s3 = inlined_call_operand.hbm [shape: f32[128,128], index: 3, kind: input, shape index: {}]   ;;  %s736_s4 = inlined_call_operand.vmem [shape: f32[1,128], index: 4, kind: input, shape index: {}]   ;;  %s737_s5 = inlined_call_operand.hbm [shape: f32[8,128], index: 5, kind: output, shape index: {}]  }
   0x1   :  { %11 = vsyncpa [#allocation7], 0 }
   0x2   :  { %12 = vsyncpa [#allocation5], 0 }
   0x3   :  { %17 = vsyncadd [#allocation4], 384  ;;  %s605_s18 = smov [#allocation6]   ;;  %s511_s22 = scalar_lea.hbm %s733_s1, 512 }
   0x4   :  { %s30_s19 = sshll.u32 %s605_s18, 4  ;;  %p512_p0 = scmp.ne.s32.totalorder %s733_s1, %s511_s22  ;;  %s31_s19 = int_to_ptr.vmem [resolvable:$true] %s30_s19 }
   0x5   :  { %p515_p1 = scmp.lt.u32.totalorder %s511_s22, %s733_s1 }
   0x7   :  { %p517_p2 = pnand %p515_p1, %p512_p0 }
   0x9   :  { %520 = shalt.err (!%p517_p2)
}
   0xa   :  { %s521_s27 = scalar_lea.vmem %s31_s19, 512  ;;  %p526_p4 = scmp.lt.s32.totalorder %s31_s19, %s31_s19 }
   0xb   :  { %p522_p3 = scmp.ne.s32.totalorder %s31_s19, %s521_s27  ;;  %p527_p5 = scmp.lt.s32.totalorder %s521_s27, %s521_s27 }
   0xd   :  { %p528_p6 = por %p527_p5, %p526_p4 }
   0xf   :  { %p529_p7 = pnand %p528_p6, %p522_p3 }
  0x11   :  { %532 = shalt.err (!%p529_p7)
}
  0x12   :  { %s606_s28 = smov 128   ;;  %s607_s29 = smov 8  }
  0x13   :  { %36 = dma.hbm_to_vmem [thread:$0]  %s733_s1, 512, %s31_s19, [#allocation7], %s606_s28, %s606_s28, %s607_s29  }
  0x14   :  { %s608_s7 = smov [#allocation3]   ;;  %s533_s11 = scalar_lea.hbm %s732_s0, 128 }
  0x15   :  { %s18_s8 = sshll.u32 %s608_s7, 4  ;;  %p534_p8 = scmp.ne.s32.totalorder %s732_s0, %s533_s11  ;;  %s19_s8 = int_to_ptr.vmem [resolvable:$true] %s18_s8 }
  0x16   :  { %p537_p9 = scmp.lt.u32.totalorder %s533_s11, %s732_s0 }
  0x18   :  { %p539_p10 = pnand %p537_p9, %p534_p8 }
  0x1a   :  { %542 = shalt.err (!%p539_p10)
}
  0x1b   :  { %s543_s16 = scalar_lea.vmem %s19_s8, 128  ;;  %s547_s1 = scalar_lea.vmem %s19_s8, 512 }
  0x1c   :  { %p544_p11 = scmp.ne.s32.totalorder %s19_s8, %s543_s16  ;;  %p548_p12 = scmp.lt.s32.totalorder %s19_s8, %s19_s8 }
  0x1d   :  { %p549_p13 = scmp.lt.s32.totalorder %s547_s1, %s543_s16 }
  0x1f   :  { %p550_p0 = por %p549_p13, %p548_p12 }
  0x21   :  { %p551_p1 = pnand %p550_p0, %p544_p11 }
  0x23   :  { %554 = shalt.err (!%p551_p1)
}
  0x24   :  { %s609_s17 = smov 64   ;;  %s610_s18 = smov 4  }
  0x25   :  { %24 = dma.hbm_to_vmem [thread:$0]  %s732_s0, 128, %s19_s8, [#allocation4], %s609_s17, %s609_s17, %s610_s18  }
  0x26   :  { %s611_s21 = smov [#allocation8]   ;;  %s555_s25 = scalar_lea.hbm %s735_s3, 2048 }
  0x27   :  { %s44_s22 = sshll.u32 %s611_s21, 4  ;;  %p556_p2 = scmp.ne.s32.totalorder %s735_s3, %s555_s25  ;;  %s45_s22 = int_to_ptr.vmem [resolvable:$true] %s44_s22 }
  0x28   :  { %p559_p3 = scmp.lt.u32.totalorder %s555_s25, %s735_s3 }
  0x2a   :  { %p561_p4 = pnand %p559_p3, %p556_p2 }
  0x2c   :  { %564 = shalt.err (!%p561_p4)
}
  0x2d   :  { %s565_s7 = scalar_lea.vmem %s45_s22, 2048  ;;  %p570_p6 = scmp.lt.s32.totalorder %s45_s22, %s45_s22 }
  0x2e   :  { %p566_p5 = scmp.ne.s32.totalorder %s45_s22, %s565_s7  ;;  %p571_p7 = scmp.lt.s32.totalorder %s565_s7, %s565_s7 }
  0x30   :  { %p572_p8 = por %p571_p7, %p570_p6 }
  0x32   :  { %p573_p9 = pnand %p572_p8, %p566_p5 }
  0x34   :  { %576 = shalt.err (!%p573_p9)
}
  0x35   :  { %50 = dma.hbm_to_vmem [thread:$0]  %s735_s3, 2048, %s45_s22, [#allocation7], %s606_s28, %s606_s28, %s607_s29  }
  0x36   :  { %599 = dma.done.wait [#allocation4], 512  }
  0x37   :  { %600 = vsyncadd [#allocation4], 4294966784 }
  0x38   :  { %601 = dma.done.wait [#allocation7], 2560  }
  0x39   :  { %602 = vsyncadd [#allocation7], 4294964736  ;;  %vm66_vm0 = vcmask 261120   ;;  %v612_v0 = vmov 0.0|0.0   ;;  %v613_v1 = vmov 0.0   ;;  %vm614_vm1 = vmmov 0  }
  0x3a   :  { %466 = vmatprep.subr.bf16.mxu0 %v612_v0  ;;  %67 = vst.msk [vmem:[#allocation2] sm:$0xff] %vm66_vm0, %v613_v1  ;;  %472 = vmatprep.subr.bf16.mxu1 %v612_v0  ;;  %v172_v2 = vld [vmem:[#allocation6] sm:$0xff]  ;;  %v173_v3 = vld [vmem:[#allocation6 + $0x8] sm:$0xff]  ;;  %v174_v4 = vld [vmem:[#allocation6 + $0x10] sm:$0xff]  ;;  %vm150_vm2 = vcmask 1041409   ;;  %vm152_vm3 = vcmask 1042434  }
  0x3b   :  { %428 = vmatprep.mubr.msk.f32.mxu0 %vm614_vm1, %v613_v1  ;;  %463 = vmatprep.mubr.msk.f32.mxu1 %vm614_vm1, %v613_v1  ;;  %v467_v5 = vpack.c.bf16 %v173_v3, %v172_v2  ;;  %v175_v6 = vld [vmem:[#allocation6 + $0x18] sm:$0xff]  ;;  %v380_v7 = vld [vmem:[#allocation3] sm:$0xff]   ;;  %v395_v8 = vld [vmem:[#allocation3 + $0x8] sm:$0xff]   ;;  %vm154_vm4 = vcmask 1043459   ;;  %vm156_vm5 = vcmask 1044484   ;;  %vm158_vm6 = vcmask 1045509  }
  0x3c   :  { %v470_v9 = vpack.c.bf16 %v175_v6, %v174_v4  ;;  %v381_v10 = vunpack.c.l.bf16 %v380_v7  ;;  %v382_v11 = vunpack.c.h.bf16 %v380_v7  ;;  %v385_v12 = vunpack.c.l.bf16 %v395_v8  ;;  %v396_v13 = vld [vmem:[#allocation3 + $0x10] sm:$0xff]   ;;  %v397_v14 = vld [vmem:[#allocation3 + $0x18] sm:$0xff]   ;;  %v257_v63 = vld [vmem:[#allocation8] sm:$0xff] }
  0x3d   :  { %468 = vmatpush3.bf16.msra.mxu0 %v467_v5  ;;  %v386_v15 = vunpack.c.h.bf16 %v395_v8  ;;  %v389_v16 = vunpack.c.l.bf16 %v396_v13  ;;  %v390_v17 = vunpack.c.h.bf16 %v396_v13  ;;  %v393_v18 = vunpack.c.l.bf16 %v397_v14  ;;  %v258_v1 = vld [vmem:[#allocation8 + $0x8] sm:$0xff] }
  0x3e   :  { %469 = vmatprep.subr.bf16.mxu0 %v612_v0  ;;  %v394_v19 = vunpack.c.h.bf16 %v397_v14  ;;  %v86_v20 = vsel %vm66_vm0, %v381_v10, 0.0  ;;  %v93_v21 = vsel %vm66_vm0, %v382_v11, 0.0  ;;  %v100_v22 = vsel %vm66_vm0, %v385_v12, 0.0  ;;  %v259_v10 = vld [vmem:[#allocation8 + $0x10] sm:$0xff]  ;;  %v260_v11 = vld [vmem:[#allocation8 + $0x18] sm:$0xff] }
  0x3f   :  { %v87_v23 = vrot.slane %v86_v20, 4  ;;  %v94_v24 = vrot.slane %v93_v21, 4  ;;  %v101_v25 = vrot.slane %v100_v22, 4  ;;  %v107_v26 = vsel %vm66_vm0, %v386_v15, 0.0 }
  0x40   :  { %v108_v27 = vrot.slane %v107_v26, 4  ;;  %v114_v28 = vsel %vm66_vm0, %v389_v16, 0.0  ;;  %v121_v29 = vsel %vm66_vm0, %v390_v17, 0.0  ;;  %v128_v30 = vsel %vm66_vm0, %v393_v18, 0.0 }
  0x41   :  { %471 = vmatpush3.bf16.msra.mxu0 %v470_v9  ;;  %v88_v31 = vadd.f32 %v87_v23, %v86_v20  ;;  %v95_v32 = vadd.f32 %v94_v24, %v93_v21  ;;  %v102_v33 = vadd.f32 %v101_v25, %v100_v22  ;;  %v115_v34 = vrot.slane %v114_v28, 4  ;;  %v261_v23 = vld [vmem:[#allocation8 + $0x20] sm:$0xff]  ;;  %v262_v24 = vld [vmem:[#allocation8 + $0x28] sm:$0xff]  ;;  %v84_v25 = vld [vmem:[#allocation2] sm:$0xff] }
  0x42   :  { %v109_v35 = vadd.f32 %v108_v27, %v107_v26  ;;  %v122_v36 = vrot.slane %v121_v29, 4  ;;  %v129_v37 = vrot.slane %v128_v30, 4  ;;  %v135_v38 = vsel %vm66_vm0, %v394_v19, 0.0 }
  0x43   :  { %v89_v39 = vrot.slane %v88_v31, 2  ;;  %v96_v40 = vrot.slane %v95_v32, 2  ;;  %v103_v41 = vrot.slane %v102_v33, 2  ;;  %v116_v42 = vadd.f32 %v115_v34, %v114_v28  ;;  %v265_v34 = vld [vmem:[#allocation8 + $0x40] sm:$0xff] }
  0x44   :  { %v110_v43 = vrot.slane %v109_v35, 2  ;;  %v123_v44 = vadd.f32 %v122_v36, %v121_v29  ;;  %v130_v45 = vadd.f32 %v129_v37, %v128_v30  ;;  %v136_v46 = vrot.slane %v135_v38, 4  ;;  %v267_v37 = vld [vmem:[#allocation8 + $0x50] sm:$0xff] }
  0x45   :  { %v90_v47 = vadd.f32 %v89_v39, %v88_v31  ;;  %v97_v48 = vadd.f32 %v96_v40, %v95_v32  ;;  %v104_v49 = vadd.f32 %v103_v41, %v102_v33  ;;  %v117_v50 = vrot.slane %v116_v42, 2  ;;  %v263_v31 = vld [vmem:[#allocation8 + $0x30] sm:$0xff]  ;;  %v264_v32 = vld [vmem:[#allocation8 + $0x38] sm:$0xff] }
  0x46   :  { %v111_v51 = vadd.f32 %v110_v43, %v109_v35  ;;  %v124_v52 = vrot.slane %v123_v44, 2  ;;  %v131_v53 = vrot.slane %v130_v45, 2  ;;  %v137_v54 = vadd.f32 %v136_v46, %v135_v38  ;;  %v266_v35 = vld [vmem:[#allocation8 + $0x48] sm:$0xff]  ;;  %v268_v38 = vld [vmem:[#allocation8 + $0x58] sm:$0xff] }
  0x47   :  { %v91_v55 = vrot.slane %v90_v47, 1  ;;  %v98_v56 = vrot.slane %v97_v48, 1  ;;  %v105_v57 = vrot.slane %v104_v49, 1  ;;  %v118_v58 = vadd.f32 %v117_v50, %v116_v42  ;;  %v269_v42 = vld [vmem:[#allocation8 + $0x60] sm:$0xff]  ;;  %v270_v43 = vld [vmem:[#allocation8 + $0x68] sm:$0xff]  ;;  %v272_v46 = vld [vmem:[#allocation8 + $0x78] sm:$0xff] }
  0x48   :  { %v112_v59 = vrot.slane %v111_v51, 1  ;;  %v125_v60 = vadd.f32 %v124_v52, %v123_v44  ;;  %v132_v61 = vadd.f32 %v131_v53, %v130_v45  ;;  %v138_v62 = vrot.slane %v137_v54, 2  ;;  %v271_v45 = vld [vmem:[#allocation8 + $0x70] sm:$0xff]  ;;  %v378_v53 = vld [vmem:[%s736_s4] ss:$0 sm:$0xff] }
  0x49   :  { %v92_v2 = vadd.f32 %v91_v55, %v90_v47  ;;  %v99_v3 = vadd.f32 %v98_v56, %v97_v48  ;;  %v106_v4 = vadd.f32 %v105_v57, %v104_v49  ;;  %v119_v5 = vrot.slane %v118_v58, 1  ;;  %v376_v48 = vld [vmem:[%s734_s2] ss:$0 sm:$0xff]  ;;  %s615_s2 = smov [#allocation9]  }
  0x4a   :  { %v113_v6 = vadd.f32 %v112_v59, %v111_v51  ;;  %v126_v7 = vrot.slane %v125_v60, 1  ;;  %v133_v8 = vrot.slane %v132_v61, 1  ;;  %v139_v9 = vadd.f32 %v138_v62, %v137_v54  ;;  %s366_s10 = sshll.u32 %s615_s2, 4  ;;  %s367_s10 = int_to_ptr.vmem [resolvable:$true] %s366_s10 }
  0x4b   :  { %v120_v12 = vadd.f32 %v119_v5, %v118_v58  ;;  %v151_v13 = vsel %vm150_vm2, %v99_v3, %v92_v2  ;;  %v473_v14 = vpack.c.bf16 %v258_v1, %v257_v63  ;;  %vm160_vm7 = vcmask 1046534   ;;  %s577_s11 = scalar_lea.vmem %s367_s10, 128  ;;  %p582_p11 = scmp.lt.s32.totalorder %s367_s10, %s367_s10 }
  0x4c   :  { %v127_v15 = vadd.f32 %v126_v7, %v125_v60  ;;  %v134_v16 = vadd.f32 %v133_v8, %v132_v61  ;;  %v140_v17 = vrot.slane %v139_v9, 1  ;;  %v153_v18 = vsel %vm152_vm3, %v106_v4, %v151_v13  ;;  %p578_p10 = scmp.ne.s32.totalorder %s367_s10, %s577_s11  ;;  %p583_p12 = scmp.lt.s32.totalorder %s577_s11, %s577_s11 }
  0x4d   :  { %v155_v19 = vsel %vm154_vm4, %v113_v6, %v153_v18  ;;  %474 = vmatpush3.bf16.msra.mxu1 %v473_v14  ;;  %v476_v20 = vpack.c.bf16 %v260_v11, %v259_v10  ;;  %vm162_vm8 = vcmask 1047559   ;;  %v479_v29 = vpack.c.bf16 %v262_v24, %v261_v23 }
  0x4e   :  { %v141_v21 = vadd.f32 %v140_v17, %v139_v9  ;;  %v157_v22 = vsel %vm156_vm5, %v120_v12, %v155_v19  ;;  %475 = vmatprep.subr.bf16.mxu1 %v612_v0  ;;  %v482_v33 = vpack.c.bf16 %v264_v32, %v263_v31  ;;  %v485_v36 = vpack.c.bf16 %v266_v35, %v265_v34  ;;  %p584_p13 = por %p583_p12, %p582_p11 }
  0x4f   :  { %v159_v26 = vsel %vm158_vm6, %v127_v15, %v157_v22  ;;  %v488_v41 = vpack.c.bf16 %v268_v38, %v267_v37  ;;  %v491_v44 = vpack.c.bf16 %v270_v43, %v269_v42  ;;  %v494_v47 = vpack.c.bf16 %v272_v46, %v271_v45 }
  0x50   :  { %v161_v27 = vsel %vm160_vm7, %v134_v16, %v159_v26  ;;  %p585_p0 = pnand %p584_p13, %p578_p10 }
  0x51   :  { %v163_v28 = vsel %vm162_vm8, %v141_v21, %v161_v27  ;;  %477 = vmatpush3.bf16.msra.mxu1 %v476_v20 }
  0x52   :  { %v165_v30 = vadd.f32 %v163_v28, %v84_v25  ;;  %478 = vmatprep.subr.bf16.mxu1 %v612_v0 }
  0x54   :  { %166 = vst.msk [vmem:[#allocation2] sm:$0xff] %vm66_vm0, %v165_v30 }
  0x55   :  { %480 = vmatpush3.bf16.msra.mxu1 %v479_v29 }
  0x56   :  { %481 = vmatprep.subr.bf16.mxu1 %v612_v0 }
  0x59   :  { %483 = vmatpush3.bf16.msra.mxu1 %v482_v33 }
  0x5a   :  { %484 = vmatprep.subr.bf16.mxu1 %v612_v0 }
  0x5b   :  { %v170_v39 = vld [vmem:[#allocation2] sm:$0xff] }
  0x5c   :  { %v171_v40 = vmul.f32 0.125, %v170_v39 }
  0x5d   :  { %486 = vmatpush3.bf16.msra.mxu1 %v485_v36 }
  0x5e   :  { %429 = vmatmul.mubr.msk.f32.vlgmr.msra.gmra.mrb[0].mxu0 %vm66_vm0, %v171_v40  ;;  %487 = vmatprep.subr.bf16.mxu1 %v612_v0 }
  0x61   :  { %489 = vmatpush3.bf16.msra.mxu1 %v488_v41 }
  0x62   :  { %490 = vmatprep.subr.bf16.mxu1 %v612_v0 }
  0x65   :  { %492 = vmatpush3.bf16.msra.mxu1 %v491_v44 }
  0x66   :  { %493 = vmatprep.subr.bf16.mxu1 %v612_v0 }
  0x69   :  { %495 = vmatpush3.bf16.msra.mxu1 %v494_v47 }
 0x131   :  { %v252_v49 = vpop.f32.mrb[0].mxu0 }
 0x132   :  { %v253_v50 = vadd.f32 %v376_v48, %v252_v49  ;;  %v430_v51 = vpop.f32.mrb[1].mxu0 }
 0x134   :  { %v256_v52 = vmax.f32 %v253_v50, 0.0 }
 0x136   :  { %464 = vmatmul.mubr.f32.vlgmr.msra.gmra.mrb[0].mxu1 %v256_v52 }
 0x209   :  { %v346_v54 = vpop.f32.mrb[0].mxu1 }
 0x20a   :  { %v347_v55 = vadd.f32 %v378_v53, %v346_v54  ;;  %v465_v0 = vpop.f32.mrb[1].mxu1 }
 0x20c   :  { %350 = vmax.xlane.f32.xlu0 %v347_v55 }
 0x299   :  { %v351_v56 = vpop.xlane.xlu0 %350 }
 0x29a   :  { %v352_v57 = vsub.f32 %v347_v55, %v351_v56 }
 0x29c   :  { %v353_v58 = vmul.f32 1.442695, %v352_v57 }
 0x29e   :  { %507 = vpow2.f32 %v353_v58 }
 0x2a8   :  { %v508_v59 = vpop.eup %507 }
 0x2a9   :  { %355 = vadd.xlane.f32.xlu0 %v508_v59 }
 0x336   :  { %v356_v60 = vpop.xlane.xlu0 %355 }
 0x337   :  { %509 = vrcp.f32 %v356_v60 }
 0x341   :  { %v510_v61 = vpop.eup %509 }
 0x342   :  { %v358_v62 = vmul.f32 %v510_v61, %v508_v59 }
 0x344   :  { %359 = vst [vmem:[#allocation9] sm:$0xff] %v358_v62 }
 0x345   :  { %588 = shalt.err (!%p585_p0)
}
 0x346   :  { %s589_s13 = scalar_lea.hbm %s737_s5, 128 }
 0x347   :  { %p590_p1 = scmp.ne.s32.totalorder %s737_s5, %s589_s13  ;;  %p593_p2 = scmp.lt.u32.totalorder %s589_s13, %s737_s5 }
 0x349   :  { %p595_p3 = pnand %p593_p2, %p590_p1 }
 0x34b   :  { %598 = shalt.err (!%p595_p3)
}
 0x34c   :  { %369 = dma.vmem_to_hbm [thread:$0]  %s367_s10, 128, %s737_s5, [#allocation5]  }
 0x34d   :  { %603 = dma.done.wait [#allocation5], 128  }
 0x34e   :  { %604 = vsyncadd [#allocation5], 4294967168 }
 0x34f   :  { %373 = vsyncpa [#allocation4], 1 }
 0x350   :  { %374 = vsyncpa [#allocation7], 1 }
 0x351   :  { %375 = vsyncpa [#allocation5], 1 }

</bundles_post_ra>
